<compile_context>
chip_gen: v7x
topology: tpu7x:2x2x1
jax: 0.10.0
libtpu: 0.0.40
codegen_flags: <defaults>
</compile_context>

<pallas_src>
import jax
import jax.numpy as jnp
from jax.experimental import pallas as pl
from jax.experimental.pallas import tpu as pltpu

LANE = 128            # lane width of the flattened slab
MAX_BLOCK_ROWS = 4096  # 4096*128*4B = 2 MiB per input per block (8 MiB VMEM w/ dbl-buf)


def _dice_kernel(x_ref, t_ref, o_ref, inter_acc, denom_acc):
    # inter_acc, denom_acc: VMEM (8, LANE) f32 running lane-wise partial sums.
    i = pl.program_id(0)

    @pl.when(i == 0)
    def _():
        inter_acc[...] = jnp.zeros_like(inter_acc)
        denom_acc[...] = jnp.zeros_like(denom_acc)

    x = x_ref[...].astype(jnp.float32)          # (block_rows, LANE)
    t = t_ref[...].astype(jnp.float32)

    # Fold rows into (8, LANE) vreg-shaped partials with VPU-only adds.
    inter_acc[...] += (x * t).reshape(-1, 8, LANE).sum(axis=0)
    denom_acc[...] += (x + t).reshape(-1, 8, LANE).sum(axis=0)

    @pl.when(i == pl.num_programs(0) - 1)
    def _():
        inter = jnp.sum(inter_acc[...])
        denom = jnp.sum(denom_acc[...])
        # NOTE: matches the reference exactly — division by zero -> NaN for
        # all-zero inputs, since the original module's `smooth=1` is unused.
        o_ref[0, 0] = 2.0 * inter / denom


def dice(inp, tgt):
    assert inp.shape == tgt.shape
    x = inp.reshape(-1)
    t = tgt.reshape(-1)
    total = x.shape[0]

    # Rows needed for a lane-dense (rows, 128) slab, sublane-aligned (mult. of 8).
    rows_min = (total + LANE - 1) // LANE
    rows_min = ((rows_min + 7) // 8) * 8

    if rows_min <= MAX_BLOCK_ROWS:
        # Fast path: single block covers everything, grid of size 1.
        block_rows = rows_min
        rows = rows_min
    else:
        block_rows = MAX_BLOCK_ROWS
        rows = ((rows_min + block_rows - 1) // block_rows) * block_rows

    padded = rows * LANE
    if padded != total:
        # At most one block of zero padding; zeros are neutral for all sums.
        # TODO(synk): for very large non-aligned inputs this pad is still a
        # full copy — an in-kernel iota mask on the last block would avoid it.
        x = jnp.pad(x, (0, padded - total))
        t = jnp.pad(t, (0, padded - total))

    x = x.reshape(rows, LANE)
    t = t.reshape(rows, LANE)

    grid = (rows // block_rows,)
    out = pl.pallas_call(
        _dice_kernel,
        out_shape=jax.ShapeDtypeStruct((1, 1), jnp.float32),
        grid_spec=pltpu.PrefetchScalarGridSpec(
            num_scalar_prefetch=0,
            grid=grid,
            in_specs=[
                pl.BlockSpec((block_rows, LANE), lambda i: (i, 0)),
                pl.BlockSpec((block_rows, LANE), lambda i: (i, 0)),
            ],
            out_specs=pl.BlockSpec(
                (1, 1), lambda i: (0, 0),
                memory_space=pltpu.MemorySpace.SMEM),
            scratch_shapes=[
                pltpu.VMEM((8, LANE), jnp.float32),   # intersection partials
                pltpu.VMEM((8, LANE), jnp.float32),   # sum(x) + sum(t) partials
            ],
        ),
        compiler_params=pltpu.CompilerParams(
            dimension_semantics=("arbitrary",),      # reduction axis
            vmem_limit_bytes=32 * 1024 * 1024,       # explicit; safe on v5e/v6e/v7x
        ),
    )(x, t)
    return out[0, 0]


def _dice_ref(inp, tgt):
    n = inp.shape[0]
    x = inp.reshape(n, -1).astype(jnp.float32)
    t = tgt.reshape(n, -1).astype(jnp.float32)
    return 2.0 * jnp.sum(x * t) / (jnp.sum(x) + jnp.sum(t))


if __name__ == "__main__":
    key = jax.random.PRNGKey(0)
    k1, k2 = jax.random.split(key)
    # NCHW, small shapes: batch=2, channels=4, spatial=16x16
    inp = jax.random.uniform(k1, (2, 4, 16, 16), dtype=jnp.float32)
    tgt = (jax.random.uniform(k2, (2, 4, 16, 16)) > 0.5).astype(jnp.float32)

    out = dice(inp, tgt)
    jax.block_until_ready(out)

    ref = _dice_ref(inp, tgt)
    assert jnp.allclose(out, ref, rtol=1e-5, atol=1e-6), (out, ref)
    print("KERNEL_OK")
</pallas_src>

<mosaic_0001>
module attributes {stable_mosaic.version = 11 : i64} {
  func.func @_dice_kernel(%arg0: i32, %arg1: memref<16x128xf32, #tpu.memory_space<vmem>>, %arg2: memref<16x128xf32, #tpu.memory_space<vmem>>, %arg3: memref<1x1xf32, #tpu.memory_space<smem>>, %arg4: memref<8x128xf32, #tpu.memory_space<vmem>>, %arg5: memref<8x128xf32, #tpu.memory_space<vmem>>) attributes {dimension_semantics = [#tpu.dimension_semantics<arbitrary>], iteration_bounds = array<i64: 1>, scalar_prefetch = 0 : i64, scratch_operands = 2 : i64, tpu.core_type = #tpu.core_type<tc>, window_params = [{transform_indices = @transform_0, window_bounds = array<i64: 16, 128>}, {transform_indices = @transform_1, window_bounds = array<i64: 16, 128>}, {transform_indices = @transform_2, window_bounds = array<i64: 1, 1>}]} {
    %c0_i32 = arith.constant 0 : i32
    %0 = arith.cmpi eq, %arg0, %c0_i32 : i32
    %1 = arith.extui %0 : i1 to i32
    %c0_i32_0 = arith.constant 0 : i32
    %2 = arith.cmpi ne, %1, %c0_i32_0 : i32
    scf.if %2 {
      %cst_15 = arith.constant 0.000000e+00 : f32
      %20 = vector.broadcast %cst_15 : f32 to vector<8x128xf32>
      %c0_16 = arith.constant 0 : index
      %c0_17 = arith.constant 0 : index
      %21 = vector.load %arg4[%c0_16, %c0_17] : memref<8x128xf32, #tpu.memory_space<vmem>>, vector<8x128xf32>
      tpu.vector_store %arg4[%c0_16, %c0_17], %20 {strides = array<i32>} : memref<8x128xf32, #tpu.memory_space<vmem>>, vector<8x128xf32>,
      %cst_18 = arith.constant 0.000000e+00 : f32
      %22 = vector.broadcast %cst_18 : f32 to vector<8x128xf32>
      %c0_19 = arith.constant 0 : index
      %c0_20 = arith.constant 0 : index
      %23 = vector.load %arg5[%c0_19, %c0_20] : memref<8x128xf32, #tpu.memory_space<vmem>>, vector<8x128xf32>
      tpu.vector_store %arg5[%c0_19, %c0_20], %22 {strides = array<i32>} : memref<8x128xf32, #tpu.memory_space<vmem>>, vector<8x128xf32>,
    } else {
    }
    %c0 = arith.constant 0 : index
    %c0_1 = arith.constant 0 : index
    %3 = vector.load %arg1[%c0, %c0_1] : memref<16x128xf32, #tpu.memory_space<vmem>>, vector<16x128xf32>
    %c0_2 = arith.constant 0 : index
    %c0_3 = arith.constant 0 : index
    %4 = vector.load %arg2[%c0_2, %c0_3] : memref<16x128xf32, #tpu.memory_space<vmem>>, vector<16x128xf32>
    %c0_4 = arith.constant 0 : index
    %c0_5 = arith.constant 0 : index
    %5 = vector.load %arg4[%c0_4, %c0_5] : memref<8x128xf32, #tpu.memory_space<vmem>>, vector<8x128xf32>
    %6 = arith.mulf %3, %4 : vector<16x128xf32>
    %7 = vector.shape_cast %6 : vector<16x128xf32> to vector<2x8x128xf32>
    %cst = arith.constant dense<0.000000e+00> : vector<8x128xf32>
    %8 = vector.multi_reduction <add>, %7, %cst [0] : vector<2x8x128xf32> to vector<8x128xf32>
    %9 = arith.addf %5, %8 : vector<8x128xf32>
    %c0_6 = arith.constant 0 : index
    %c0_7 = arith.constant 0 : index
    %10 = vector.load %arg4[%c0_6, %c0_7] : memref<8x128xf32, #tpu.memory_space<vmem>>, vector<8x128xf32>
    tpu.vector_store %arg4[%c0_6, %c0_7], %9 {strides = array<i32>} : memref<8x128xf32, #tpu.memory_space<vmem>>, vector<8x128xf32>,
    %c0_8 = arith.constant 0 : index
    %c0_9 = arith.constant 0 : index
    %11 = vector.load %arg5[%c0_8, %c0_9] : memref<8x128xf32, #tpu.memory_space<vmem>>, vector<8x128xf32>
    %12 = arith.addf %3, %4 : vector<16x128xf32>
    %13 = vector.shape_cast %12 : vector<16x128xf32> to vector<2x8x128xf32>
    %cst_10 = arith.constant dense<0.000000e+00> : vector<8x128xf32>
    %14 = vector.multi_reduction <add>, %13, %cst_10 [0] : vector<2x8x128xf32> to vector<8x128xf32>
    %15 = arith.addf %11, %14 : vector<8x128xf32>
    %c0_11 = arith.constant 0 : index
    %c0_12 = arith.constant 0 : index
    %16 = vector.load %arg5[%c0_11, %c0_12] : memref<8x128xf32, #tpu.memory_space<vmem>>, vector<8x128xf32>
    tpu.vector_store %arg5[%c0_11, %c0_12], %15 {strides = array<i32>} : memref<8x128xf32, #tpu.memory_space<vmem>>, vector<8x128xf32>,
    %c0_i32_13 = arith.constant 0 : i32
    %17 = arith.cmpi eq, %arg0, %c0_i32_13 : i32
    %18 = arith.extui %17 : i1 to i32
    %c0_i32_14 = arith.constant 0 : i32
    %19 = arith.cmpi ne, %18, %c0_i32_14 : i32
    scf.if %19 {
      %c0_15 = arith.constant 0 : index
      %c0_16 = arith.constant 0 : index
      %20 = vector.load %arg4[%c0_15, %c0_16] : memref<8x128xf32, #tpu.memory_space<vmem>>, vector<8x128xf32>
      %21 = vector.shape_cast %20 : vector<8x128xf32> to vector<1x8x128xf32>
      %cst_17 = arith.constant dense<0.000000e+00> : vector<1xf32>
      %22 = vector.multi_reduction <add>, %21, %cst_17 [1, 2] : vector<1x8x128xf32> to vector<1xf32>
      %23 = vector.shape_cast %22 : vector<1xf32> to vector<1x1x1xf32>
      %24 = vector.extract %23[0, 0, 0] : f32 from vector<1x1x1xf32>
      %c0_18 = arith.constant 0 : index
      %c0_19 = arith.constant 0 : index
      %25 = vector.load %arg5[%c0_18, %c0_19] : memref<8x128xf32, #tpu.memory_space<vmem>>, vector<8x128xf32>
      %26 = vector.shape_cast %25 : vector<8x128xf32> to vector<1x8x128xf32>
      %cst_20 = arith.constant dense<0.000000e+00> : vector<1xf32>
      %27 = vector.multi_reduction <add>, %26, %cst_20 [1, 2] : vector<1x8x128xf32> to vector<1xf32>
      %28 = vector.shape_cast %27 : vector<1xf32> to vector<1x1x1xf32>
      %29 = vector.extract %28[0, 0, 0] : f32 from vector<1x1x1xf32>
      %cst_21 = arith.constant 2.000000e+00 : f32
      %30 = arith.mulf %cst_21, %24 : f32
      %31 = arith.divf %30, %29 : f32
      %c0_22 = arith.constant 0 : index
      %c0_23 = arith.constant 0 : index
      %32 = memref.load %arg3[%c0_22, %c0_23] : memref<1x1xf32, #tpu.memory_space<smem>>
      memref.store %31, %arg3[%c0_22, %c0_23] : memref<1x1xf32, #tpu.memory_space<smem>>
    } else {
    }
    return
  }
  func.func @transform_0(%arg0: i32) -> (i32, i32) {
    %c0_i32 = arith.constant 0 : i32
    %c0_i32_0 = arith.constant 0 : i32
    return %arg0, %c0_i32 : i32, i32
  }
  func.func @transform_1(%arg0: i32) -> (i32, i32) {
    %c0_i32 = arith.constant 0 : i32
    %c0_i32_0 = arith.constant 0 : i32
    return %arg0, %c0_i32 : i32, i32
  }
  func.func @transform_2(%arg0: i32) -> (i32, i32) {
    %c0_i32 = arith.constant 0 : i32
    %c0_i32_0 = arith.constant 0 : i32
    %c0_i32_1 = arith.constant 0 : i32
    return %c0_i32, %c0_i32_0 : i32, i32
  }
}

</mosaic_0001>

<bundles_post_ra>
// kernel: tpu_custom_call.1
= control target key start
LH: loop header
LB: loop body
LE: loop exit
PB: predicated region body
PF: predicated region fallthrough
CT: control target
= control target key end

     0   :  { %7 = vsyncpa [#allocation5], 0  ;;  %s236_s0 = inlined_call_operand.hbm [shape: f32[16,128], index: 0, kind: input, shape index: {}]   ;;  %s237_s1 = inlined_call_operand.hbm [shape: f32[16,128], index: 1, kind: input, shape index: {}]   ;;  %s238_s2 = inlined_call_operand.hbm [shape: f32[1,1], index: 2, kind: output, shape index: {}]  }
   0x1   :  { %8 = vsyncpa [#allocation8], 0 }
   0x2   :  { %9 = vsyncpa [#allocation6], 0  ;;  %s180_s9 = smov [#allocation4]   ;;  %s120_s13 = scalar_lea.hbm %s236_s0, 256 }
   0x3   :  { %s15_s10 = sshll.u32 %s180_s9, 4  ;;  %p121_p0 = scmp.ne.s32.totalorder %s236_s0, %s120_s13  ;;  %s16_s10 = int_to_ptr.vmem [resolvable:$true] %s15_s10 }
   0x4   :  { %p124_p1 = scmp.lt.u32.totalorder %s120_s13, %s236_s0 }
   0x6   :  { %p126_p2 = pnand %p124_p1, %p121_p0 }
   0x8   :  { %129 = shalt.err (!%p126_p2)
}
   0x9   :  { %s130_s18 = scalar_lea.vmem %s16_s10, 256  ;;  %p135_p4 = scmp.lt.s32.totalorder %s16_s10, %s16_s10 }
   0xa   :  { %p131_p3 = scmp.ne.s32.totalorder %s16_s10, %s130_s18  ;;  %p136_p5 = scmp.lt.s32.totalorder %s130_s18, %s130_s18 }
   0xc   :  { %p137_p6 = por %p136_p5, %p135_p4 }
   0xe   :  { %p138_p7 = pnand %p137_p6, %p131_p3 }
  0x10   :  { %141 = shalt.err (!%p138_p7)
}
  0x11   :  { %s181_s19 = smov 128   ;;  %s182_s20 = smov 8  }
  0x12   :  { %21 = dma.hbm_to_vmem [thread:$0]  %s236_s0, 256, %s16_s10, [#allocation5], %s181_s19, %s181_s19, %s182_s20  }
  0x13   :  { %s183_s23 = smov [#allocation7]   ;;  %s142_s27 = scalar_lea.hbm %s237_s1, 256 }
  0x14   :  { %s27_s24 = sshll.u32 %s183_s23, 4  ;;  %p143_p8 = scmp.ne.s32.totalorder %s237_s1, %s142_s27  ;;  %s28_s24 = int_to_ptr.vmem [resolvable:$true] %s27_s24 }
  0x15   :  { %p146_p9 = scmp.lt.u32.totalorder %s142_s27, %s237_s1 }
  0x17   :  { %p148_p10 = pnand %p146_p9, %p143_p8 }
  0x19   :  { %151 = shalt.err (!%p148_p10)
}
  0x1a   :  { %s152_s4 = scalar_lea.vmem %s28_s24, 256  ;;  %p157_p12 = scmp.lt.s32.totalorder %s28_s24, %s28_s24 }
  0x1b   :  { %p153_p11 = scmp.ne.s32.totalorder %s28_s24, %s152_s4  ;;  %p158_p13 = scmp.lt.s32.totalorder %s152_s4, %s152_s4 }
  0x1d   :  { %p159_p0 = por %p158_p13, %p157_p12 }
  0x1f   :  { %p160_p1 = pnand %p159_p0, %p153_p11 }
  0x21   :  { %163 = shalt.err (!%p160_p1)
}
  0x22   :  { %33 = dma.hbm_to_vmem [thread:$0]  %s237_s1, 256, %s28_s24, [#allocation8], %s181_s19, %s181_s19, %s182_s20  }
  0x23   :  { %174 = dma.done.wait [#allocation5], 256  }
  0x24   :  { %175 = vsyncadd [#allocation5], 4294967040 }
  0x25   :  { %176 = dma.done.wait [#allocation8], 256  }
  0x26   :  { %177 = vsyncadd [#allocation8], 4294967040  ;;  %v46_v0 = vld [vmem:[#allocation4] sm:$0xff]  ;;  %v47_v1 = vld [vmem:[#allocation4 + $0x8] sm:$0xff]  ;;  %s164_s12 = scalar_lea.hbm %s238_s2, 16 }
  0x27   :  { %v48_v2 = vld [vmem:[#allocation7] sm:$0xff]  ;;  %v49_v3 = vld [vmem:[#allocation7 + $0x8] sm:$0xff]  ;;  %p165_p2 = scmp.ne.s32.totalorder %s238_s2, %s164_s12  ;;  %p168_p3 = scmp.lt.u32.totalorder %s164_s12, %s238_s2 }
  0x28   :  { %v51_v4 = vmul.f32 %v48_v2, %v46_v0  ;;  %v52_v5 = vmul.f32 %v49_v3, %v47_v1  ;;  %v57_v6 = vadd.f32 %v48_v2, %v46_v0  ;;  %v58_v7 = vadd.f32 %v49_v3, %v47_v1 }
  0x29   :  { %p170_p4 = pnand %p168_p3, %p165_p2 }
  0x2a   :  { %v53_v8 = vadd.f32 %v52_v5, %v51_v4  ;;  %v59_v9 = vadd.f32 %v58_v7, %v57_v6 }
  0x2c   :  { %66 = vadd.xlane.f32.xlu0 %v53_v8 }
  0x30   :  { %76 = vadd.xlane.f32.xlu0 %v59_v9 }
  0xb9   :  { %v67_v10 = vpop.xlane.xlu0 %66 }
  0xba   :  { %v68_v11 = vrot.slane %v67_v10, 4 }
  0xbc   :  { %v69_v12 = vadd.f32 %v68_v11, %v67_v10 }
  0xbd   :  { %v77_v13 = vpop.xlane.xlu0 %76 }
  0xbe   :  { %v70_v14 = vrot.slane %v69_v12, 2  ;;  %v78_v15 = vrot.slane %v77_v13, 4 }
  0xc0   :  { %v79_v16 = vadd.f32 %v78_v15, %v77_v13  ;;  %v71_v17 = vadd.f32 %v70_v14, %v69_v12 }
  0xc2   :  { %v80_v18 = vrot.slane %v79_v16, 2  ;;  %v72_v19 = vrot.slane %v71_v17, 1 }
  0xc4   :  { %v81_v20 = vadd.f32 %v80_v18, %v79_v16  ;;  %v73_v21 = vadd.f32 %v72_v19, %v71_v17 }
  0xc6   :  { %107 = vpush %v73_v21  ;;  %v82_v22 = vrot.slane %v81_v20, 1 }
  0xc8   :  { %v83_v23 = vadd.f32 %v82_v22, %v81_v20 }
  0xca   :  { %109 = vpush %v83_v23 }
  0xf7   :  { %s108_s1 = spop %107 }
  0xf8   :  { %s85_s7 = smul.f32 2.0, %s108_s1 }
  0xfb   :  { %s110_s6 = spop %109 }
  0xfc   :  { %v86_v24 = vstv %s110_s6 }
  0xfd   :  { %118 = vrcp.f32 %v86_v24 }
 0x107   :  { %v119_v25 = vpop.eup %118 }
 0x108   :  { %111 = vpush %v119_v25 }
 0x139   :  { %s112_s8 = spop %111 }
 0x13a   :  { %s89_s9 = smul.f32 %s112_s8, %s85_s7 }
 0x13c   :  { %91 = sst [smem:[#allocation9]] %s89_s9 }
 0x13d   :  { %173 = shalt.err (!%p170_p4)
}
 0x13e   :  { %s184_s17 = smov [#allocation9]  }
 0x13f   :  { %99 = dma.smem_to_hbm %s184_s17, 16, %s238_s2, [#allocation6]  }
 0x140   :  { %178 = dma.done.wait [#allocation6], 16  }
 0x141   :  { %179 = vsyncadd [#allocation6], 4294967280 }
 0x142   :  { %103 = sfence }
 0x143   :  { %104 = vsyncpa [#allocation5], 1 }
 0x144   :  { %105 = vsyncpa [#allocation8], 1 }
 0x145   :  { %106 = vsyncpa [#allocation6], 1 }

</bundles_post_ra>
